<compile_context>
chip_gen: v6e
topology: v6e:2x2x1
jax: 0.10.0
libtpu: 0.0.40
codegen_flags: <defaults>
</compile_context>

<pallas_src>
import functools

import numpy as np
import jax
import jax.numpy as jnp
from jax.experimental import pallas as pl
from jax.experimental.pallas import tpu as pltpu


_FUSED_MAX_BYTES = 4 << 20   # whole-part-in-VMEM fused path threshold
_TILE_BYTES = 2 << 20        # row-tile size for the large-array two-pass path


# ----------------------------------------------------------------------------
# Kernels
# ----------------------------------------------------------------------------
def _fused_kernel(x_ref, o_ref):
    """Whole array resident in VMEM: o = x / sum(x) in a single invocation."""
    x = x_ref[...]                      # (rows, width) f32
    total = jnp.sum(x)                  # XLU reduce
    o_ref[...] = x * (1.0 / total)


def _sum_kernel(x_ref, s_ref, *, num_rows, tile_rows, need_mask):
    """Accumulate the total sum of x (tiled along rows) into a (1,1) block."""
    t = pl.program_id(0)

    @pl.when(t == 0)
    def _():
        s_ref[...] = jnp.zeros_like(s_ref)

    x = x_ref[...]                      # (tile_rows, width) f32
    if need_mask:
        # Zero out rows of the ragged last tile that lie past the true end.
        row_ids = jax.lax.broadcasted_iota(jnp.int32, x.shape, 0) + t * tile_rows
        x = jnp.where(row_ids < num_rows, x, 0.0)
    s_ref[...] += jnp.sum(x, axis=(0, 1), keepdims=True)


def _scale_kernel(s_ref, x_ref, o_ref):
    """o = x * (1 / total_sum).  s_ref is a (1,1) scalar held in SMEM."""
    inv = 1.0 / s_ref[0, 0]
    o_ref[...] = x_ref[...] * inv


# ----------------------------------------------------------------------------
# Shape / tiling helpers
# ----------------------------------------------------------------------------
def _choose_2d_shape(shape):
    """Pick a lane-dense 2D collapse of `shape` (free contiguous reshape)."""
    n = int(np.prod(shape))
    for w in (1024, 512, 256, 128):
        if n % w == 0 and n // w > 0:
            return n // w, w
    rows = int(shape[0])
    return rows, n // rows if rows > 0 else 1


def _pick_tile_rows(num_rows, row_width):
    """Rows per tile: ~2 MiB blocks, multiple-of-8 rows (or the full extent)."""
    rows = (_TILE_BYTES // (row_width * 4)) // 8 * 8
    rows = int(max(8, rows))
    return min(rows, num_rows)


# ----------------------------------------------------------------------------
# Wrapper
# ----------------------------------------------------------------------------
def _normalize_part_impl(part):
    """Normalize one SO3 part: part / sum(part)."""
    orig_shape = part.shape
    orig_dtype = part.dtype
    rows, width = _choose_2d_shape(orig_shape)

    # Contiguous collapse: metadata-only reshape, no extra HBM pass.
    x2d = part.astype(jnp.float32).reshape(rows, width)
    nbytes = rows * width * 4

    if nbytes <= _FUSED_MAX_BYTES:
        # Fused path: one HBM read + one write, sum and scale in one kernel.
        out2d = pl.pallas_call(
            _fused_kernel,
            out_shape=jax.ShapeDtypeStruct((rows, width), jnp.float32),
            grid=(1,),
            in_specs=[pl.BlockSpec((rows, width), lambda i: (0, 0))],
            out_specs=pl.BlockSpec((rows, width), lambda i: (0, 0)),
            compiler_params=pltpu.CompilerParams(
                dimension_semantics=("arbitrary",),
                vmem_limit_bytes=64 << 20,
            ),
            cost_estimate=pl.CostEstimate(
                flops=2 * rows * width,
                transcendentals=0,
                bytes_accessed=2 * nbytes,
            ),
        )(x2d)
    else:
        # Two-pass path for large parts.
        tile_rows = _pick_tile_rows(rows, width)
        num_tiles = int(pl.cdiv(rows, tile_rows))
        need_mask = (num_tiles * tile_rows) != rows

        # Pass 1: global sum (resident (1,1) accumulator across the grid).
        total = pl.pallas_call(
            functools.partial(
                _sum_kernel,
                num_rows=rows,
                tile_rows=tile_rows,
                need_mask=need_mask,
            ),
            out_shape=jax.ShapeDtypeStruct((1, 1), jnp.float32),
            grid=(num_tiles,),
            in_specs=[pl.BlockSpec((tile_rows, width), lambda t: (t, 0))],
            out_specs=pl.BlockSpec((1, 1), lambda t: (0, 0)),
            compiler_params=pltpu.CompilerParams(
                dimension_semantics=("arbitrary",),
                vmem_limit_bytes=64 << 20,
            ),
            cost_estimate=pl.CostEstimate(
                flops=rows * width,
                transcendentals=0,
                bytes_accessed=nbytes + 4,
            ),
        )(x2d)

        # Pass 2: scale every element by 1/total.  Independent tiles ->
        # "parallel" (shards across both TensorCores on v7x).
        out2d = pl.pallas_call(
            _scale_kernel,
            out_shape=jax.ShapeDtypeStruct((rows, width), jnp.float32),
            grid=(num_tiles,),
            in_specs=[
                pl.BlockSpec(memory_space=pltpu.MemorySpace.SMEM),  # (1,1) scalar
                pl.BlockSpec((tile_rows, width), lambda t: (t, 0)),
            ],
            out_specs=pl.BlockSpec((tile_rows, width), lambda t: (t, 0)),
            compiler_params=pltpu.CompilerParams(
                dimension_semantics=("parallel",),
                vmem_limit_bytes=64 << 20,
            ),
            cost_estimate=pl.CostEstimate(
                flops=rows * width,
                transcendentals=0,
                bytes_accessed=2 * nbytes + 4,
            ),
        )(total, x2d)

    return out2d.reshape(orig_shape).astype(orig_dtype)


_normalize_part = jax.jit(_normalize_part_impl)


def normalize_vec_arr(parts, max_l):
    """Functional NormalizeVecArr.forward: returns new normalized parts list."""
    assert len(parts) == max_l + 1
    return [_normalize_part(p) for p in parts]


def ref_normalize_vec_arr(parts, max_l):
    """Pure-JAX reference mirroring the PyTorch forward loop."""
    out = []
    for l in range(max_l + 1):
        p = jnp.asarray(parts[l], jnp.float32)
        out.append(p / jnp.sum(p))
    return out


# ----------------------------------------------------------------------------
# Demo / self-test
# ----------------------------------------------------------------------------
if __name__ == "__main__":
    num_atoms, num_channels, max_l = 8, 4, 2

    key = jax.random.PRNGKey(0)
    parts = []
    for l in range(max_l + 1):
        key, sub = jax.random.split(key)
        # Positive values so the normalizing sum is well away from zero
        # (the torch module divides by the raw sum regardless of sign).
        parts.append(
            jax.random.uniform(
                sub,
                (num_atoms, 2 * l + 1, num_channels),
                jnp.float32,
                minval=0.5,
                maxval=1.5,
            )
        )

    out_parts = jax.block_until_ready(normalize_vec_arr(parts, max_l))
    ref_parts = ref_normalize_vec_arr(parts, max_l)
    for l in range(max_l + 1):
        assert out_parts[l].shape == parts[l].shape, out_parts[l].shape
        np.testing.assert_allclose(
            np.asarray(out_parts[l]),
            np.asarray(ref_parts[l]),
            rtol=1e-5,
            atol=1e-6,
        )

    # Extra check: a part large enough to take the tiled two-pass path,
    # including a ragged (masked) last tile.
    key, sub = jax.random.split(key)
    big = jax.random.uniform(
        sub, (1100, 32, 32), jnp.float32, minval=0.5, maxval=1.5
    )
    out_big = jax.block_until_ready(_normalize_part(big))
    ref_big = big / jnp.sum(big)
    np.testing.assert_allclose(
        np.asarray(out_big), np.asarray(ref_big), rtol=1e-4, atol=0.0
    )

    print("KERNEL_OK")
</pallas_src>

<mosaic_0001>
module attributes {stable_mosaic.version = 11 : i64} {
  func.func @_fused_kernel(%arg0: i32, %arg1: memref<8x4xf32, #tpu.memory_space<vmem>>, %arg2: memref<8x4xf32, #tpu.memory_space<vmem>>) attributes {dimension_semantics = [#tpu.dimension_semantics<arbitrary>], iteration_bounds = array<i64: 1>, scalar_prefetch = 0 : i64, scratch_operands = 0 : i64, tpu.core_type = #tpu.core_type<tc>, window_params = [{pipeline_mode = #tpu.pipeline_mode<synchronous>, transform_indices = @transform_0, window_bounds = array<i64: 8, 4>}, {pipeline_mode = #tpu.pipeline_mode<synchronous>, transform_indices = @transform_1, window_bounds = array<i64: 8, 4>}]} {
    %c0 = arith.constant 0 : index
    %c0_0 = arith.constant 0 : index
    %0 = vector.load %arg1[%c0, %c0_0] : memref<8x4xf32, #tpu.memory_space<vmem>>, vector<8x4xf32>
    %1 = vector.shape_cast %0 : vector<8x4xf32> to vector<1x8x4xf32>
    %cst = arith.constant dense<0.000000e+00> : vector<1xf32>
    %2 = vector.multi_reduction <add>, %1, %cst [1, 2] : vector<1x8x4xf32> to vector<1xf32>
    %3 = vector.shape_cast %2 : vector<1xf32> to vector<1x1x1xf32>
    %4 = vector.extract %3[0, 0, 0] : f32 from vector<1x1x1xf32>
    %cst_1 = arith.constant 1.000000e+00 : f32
    %5 = arith.divf %cst_1, %4 : f32
    %6 = vector.broadcast %5 : f32 to vector<8x4xf32>
    %7 = arith.mulf %0, %6 : vector<8x4xf32>
    %c0_2 = arith.constant 0 : index
    %c0_3 = arith.constant 0 : index
    %8 = vector.load %arg2[%c0_2, %c0_3] : memref<8x4xf32, #tpu.memory_space<vmem>>, vector<8x4xf32>
    tpu.vector_store %arg2[%c0_2, %c0_3], %7 {strides = array<i32>} : memref<8x4xf32, #tpu.memory_space<vmem>>, vector<8x4xf32>,
    return
  }
  func.func @transform_0(%arg0: i32) -> (i32, i32) {
    %c0_i32 = arith.constant 0 : i32
    %c0_i32_0 = arith.constant 0 : i32
    %c0_i32_1 = arith.constant 0 : i32
    return %c0_i32, %c0_i32_0 : i32, i32
  }
  func.func @transform_1(%arg0: i32) -> (i32, i32) {
    %c0_i32 = arith.constant 0 : i32
    %c0_i32_0 = arith.constant 0 : i32
    %c0_i32_1 = arith.constant 0 : i32
    return %c0_i32, %c0_i32_0 : i32, i32
  }
}

</mosaic_0001>

<bundles_post_ra>
// kernel: _normalize_part_impl.1
= control target key start
LH: loop header
LB: loop body
LE: loop exit
PB: predicated region body
PF: predicated region fallthrough
CT: control target
= control target key end

     0   :  { %vm9_vm0 = vcmask 31744   ;;  %s54_s0 = inlined_call_operand.vmem [shape: f32[8,4], index: 0, kind: input, shape index: {}]   ;;  %s55_s1 = inlined_call_operand.vmem [shape: f32[8,4], index: 1, kind: output, shape index: {}]  }
   0x1   :  { %v8_v0 = vld [vmem:[%s54_s0] sm:$0xff] }
   0x2   :  { %v10_v1 = vsel %vm9_vm0, %v8_v0, 0.0 }
   0x3   :  { %11 = vadd.xlane.f32.xlu0 %v10_v1 }
  0x8c   :  { %v12_v2 = vpop.xlane.xlu0 %11 }
  0x8d   :  { %v13_v3 = vrot.slane %v12_v2, 4 }
  0x8f   :  { %v14_v4 = vadd.f32 %v13_v3, %v12_v2 }
  0x91   :  { %v15_v5 = vrot.slane %v14_v4, 2 }
  0x93   :  { %v16_v6 = vadd.f32 %v15_v5, %v14_v4 }
  0x95   :  { %v17_v7 = vrot.slane %v16_v6, 1 }
  0x97   :  { %v18_v8 = vadd.f32 %v17_v7, %v16_v6 }
  0x99   :  { %30 = vpush %v18_v8 }
  0xca   :  { %s31_s8 = spop %30 }
  0xcb   :  { %v20_v9 = vstv %s31_s8 }
  0xcc   :  { %34 = vrcp.f32 %v20_v9 }
  0xd9   :  { %v35_v10 = vpop.eup %34 }
  0xda   :  { %32 = vpush %v35_v10 }
 0x10b   :  { %s33_s9 = spop %32 }
 0x10c   :  { %v23_v11 = vstv %s33_s9 }
 0x10d   :  { %v24_v12 = vmul.f32 %v23_v11, %v8_v0 }
 0x10f   :  { %25 = vst.msk [vmem:[%s55_s1] sm:$0xff] %vm9_vm0, %v24_v12 }

</bundles_post_ra>
